<compile_context>
chip_gen: v5e
topology: v5e:2x2
jax: 0.10.0
libtpu: 0.0.40
codegen_flags: <defaults>
</compile_context>

<pallas_src>
import functools

import jax
import jax.numpy as jnp
import numpy as np
from jax.experimental import pallas as pl
from jax.experimental.pallas import tpu as pltpu


def _conv_bn_relu_kernel(x_ref, w_ref, bias_ref, gamma_ref, beta_ref, out_ref,
                         *, H, W, C, eps):
    """Fused 3x3 conv (padding=1) + bias + BatchNorm2d(train) + ReLU.

    x_ref     : [N*H, W*C]      activations, lane index = w*C + c
    w_ref     : [3, W*C, W*C]   banded conv weights, one band per kh tap
    bias_ref  : [1, W*C]        conv bias, tiled over w
    gamma_ref : [1, W*C]        BN gamma, tiled over w
    beta_ref  : [1, W*C]        BN beta, tiled over w
    out_ref   : [N*H, W*C]
    """
    NH, WC = out_ref.shape
    M = NH * W  # N*H*W spatial positions per channel

    x = x_ref[...]

    # Vertical (kh) halo: rows shifted by +/-1 with zero fill at image borders,
    # expressed as two small shift-matrix matmuls (no relayout copies, no HBM pad).
    #   s_up[r, s] = 1 iff s == r-1 and r is not the first row of its image
    #   s_dn[r, s] = 1 iff s == r+1 and r is not the last  row of its image
    r = jax.lax.broadcasted_iota(jnp.int32, (NH, NH), 0)
    s = jax.lax.broadcasted_iota(jnp.int32, (NH, NH), 1)
    h = r % H
    s_up = ((s == r - 1) & (h != 0)).astype(jnp.float32)
    s_dn = ((s == r + 1) & (h != H - 1)).astype(jnp.float32)
    x_up = jnp.dot(s_up, x, preferred_element_type=jnp.float32)   # x[n, h-1, :, :]
    x_dn = jnp.dot(s_dn, x, preferred_element_type=jnp.float32)   # x[n, h+1, :, :]

    # im2col contraction: kw taps + channel mixing live in the banded
    # (W*C, W*C) matrices; one lane-dense matmul per kh tap.
    acc = jnp.dot(x_up, w_ref[0], preferred_element_type=jnp.float32)
    acc = acc + jnp.dot(x, w_ref[1], preferred_element_type=jnp.float32)
    acc = acc + jnp.dot(x_dn, w_ref[2], preferred_element_type=jnp.float32)
    acc = acc + bias_ref[...]

    # BatchNorm2d, training mode: per-channel batch stats over (N, H, W),
    # biased variance, eps = 1e-5.  Channel c occupies lanes with lane % C == c;
    # multiplying the row-sums by the channel-grouping matrix `grp` finishes the
    # reduction over w AND broadcasts the stats back to every lane of that
    # channel, keeping everything lane-dense (no reshape / tile relayouts).
    li = jax.lax.broadcasted_iota(jnp.int32, (WC, WC), 0)
    lj = jax.lax.broadcasted_iota(jnp.int32, (WC, WC), 1)
    grp = (li % C == lj % C).astype(jnp.float32)
    mean = jnp.dot(jnp.sum(acc, axis=0, keepdims=True), grp,
                   preferred_element_type=jnp.float32) / M
    ex2 = jnp.dot(jnp.sum(acc * acc, axis=0, keepdims=True), grp,
                  preferred_element_type=jnp.float32) / M
    var = ex2 - mean * mean
    y = (acc - mean) * jax.lax.rsqrt(var + eps) * gamma_ref[...] + beta_ref[...]

    # ReLU (the module's double relu collapses to a single one).
    out_ref[...] = jnp.maximum(y, 0.0)


def _banded_conv_weights(w_hwio, width):
    """Fold the 3x3 kw taps + channel mixing into 3 banded (W*C, W*C) matrices.

    w_hwio : [3, 3, C, C] conv weight, HWIO layout ([kh, kw, c_in, c_out]);
             PyTorch OIHW weights map via transpose(2, 3, 1, 0).
    Returns [3, W*C, W*C] with
      B[kh, w_in*C + c_in, w_out*C + c_out] = w_hwio[kh, w_in - w_out + 1, c_in, c_out]
    when |w_in - w_out| <= 1 and 0 otherwise (this band structure also encodes
    the zero padding along W).
    """
    _, _, cin, cout = w_hwio.shape
    w_idx = jnp.arange(width)
    dw = w_idx[:, None] - w_idx[None, :]                       # w_in - w_out
    valid = (jnp.abs(dw) <= 1).astype(w_hwio.dtype)            # (W, W)
    kw = jnp.clip(dw + 1, 0, 2)
    taps = w_hwio[:, kw, :, :] * valid[None, :, :, None, None]  # (3, Wi, Wo, Ci, Co)
    taps = jnp.transpose(taps, (0, 1, 3, 2, 4))                 # (3, Wi, Ci, Wo, Co)
    return taps.reshape(3, width * cin, width * cout)


def residual_block_forward(x_nchw, params, *, eps=1e-5):
    """Pallas implementation of ResidualBlock.forward.

    Returns relu(bn1(conv1(x))), which is exactly what the PyTorch module
    returns (its second conv/bn/+residual branch is dead w.r.t. the returned
    tensor because of the `ouptut` typo, so it is skipped entirely).
    """
    N, C, H, W = x_nchw.shape
    NH, WC = N * H, W * C

    # Layout glue: NCHW -> lane-dense (N*H, W*C).
    x2d = jnp.transpose(x_nchw, (0, 2, 3, 1)).reshape(NH, WC).astype(jnp.float32)

    w_banded = _banded_conv_weights(params["w1"].astype(jnp.float32), W)
    bias = jnp.tile(params["b1"].astype(jnp.float32), W).reshape(1, WC)
    gamma = jnp.tile(params["g1"].astype(jnp.float32), W).reshape(1, WC)
    beta = jnp.tile(params["be1"].astype(jnp.float32), W).reshape(1, WC)

    kernel = functools.partial(_conv_bn_relu_kernel, H=H, W=W, C=C, eps=eps)
    vmem = pl.BlockSpec(memory_space=pltpu.MemorySpace.VMEM)
    out2d = pl.pallas_call(
        kernel,
        out_shape=jax.ShapeDtypeStruct((NH, WC), jnp.float32),
        in_specs=[vmem] * 5,
        out_specs=vmem,
        # Gridless on purpose: everything fits in VMEM at these shapes and BN
        # batch stats need the whole batch.  Tiling / megacore splitting would
        # require a two-pass (or cross-tile accumulator) BN reduction.
    )(x2d, w_banded, bias, gamma, beta)

    # Layout glue back: (N*H, W*C) -> NCHW.
    return jnp.transpose(out2d.reshape(N, H, W, C), (0, 3, 1, 2))


def reference_forward(x_nchw, params, *, eps=1e-5):
    """Pure-JAX (XLA) reference reproducing the PyTorch forward's return value.

    Due to the `ouptut` typo in the source module, the returned tensor is
    relu(bn1(conv1(x))); the conv2/bn2/+residual branch never affects it.
    """
    y = jax.lax.conv_general_dilated(
        x_nchw.astype(jnp.float32), params["w1"].astype(jnp.float32),
        window_strides=(1, 1), padding=((1, 1), (1, 1)),
        dimension_numbers=("NCHW", "HWIO", "NCHW"),
        precision=jax.lax.Precision.HIGHEST)
    y = y + params["b1"][None, :, None, None]
    mean = jnp.mean(y, axis=(0, 2, 3), keepdims=True)
    var = jnp.mean(jnp.square(y - mean), axis=(0, 2, 3), keepdims=True)
    y = ((y - mean) * jax.lax.rsqrt(var + eps)
         * params["g1"][None, :, None, None] + params["be1"][None, :, None, None])
    return jax.nn.relu(y)


if __name__ == "__main__":
    N, C, H, W = 2, 4, 16, 16
    key = jax.random.PRNGKey(0)
    k = jax.random.split(key, 5)

    x = jax.random.normal(k[0], (N, C, H, W), dtype=jnp.float32)

    # Deterministic synthetic parameters (Conv2d weight given in HWIO layout;
    # conv2/bn2 params are omitted — dead w.r.t. the module's return value).
    params = dict(
        w1=0.2 * jax.random.normal(k[1], (3, 3, C, C), dtype=jnp.float32),  # HWIO
        b1=0.1 * jax.random.normal(k[2], (C,), dtype=jnp.float32),
        g1=1.0 + 0.1 * jax.random.normal(k[3], (C,), dtype=jnp.float32),
        be1=0.1 * jax.random.normal(k[4], (C,), dtype=jnp.float32),
    )

    out = jax.jit(residual_block_forward)(x, params)
    jax.block_until_ready(out)

    assert out.shape == x.shape, (out.shape, x.shape)
    ref = reference_forward(x, params)
    np.testing.assert_allclose(np.asarray(out), np.asarray(ref),
                               atol=1e-2, rtol=1e-2)
    print("KERNEL_OK")
</pallas_src>

<mosaic_0001>
module attributes {stable_mosaic.version = 11 : i64} {
  func.func @_conv_bn_relu_kernel(%arg0: memref<32x64xf32, #tpu.memory_space<vmem>>, %arg1: memref<3x64x64xf32, #tpu.memory_space<vmem>>, %arg2: memref<1x64xf32, #tpu.memory_space<vmem>>, %arg3: memref<1x64xf32, #tpu.memory_space<vmem>>, %arg4: memref<1x64xf32, #tpu.memory_space<vmem>>, %arg5: memref<32x64xf32, #tpu.memory_space<vmem>>) attributes {dimension_semantics = [], scalar_prefetch = 0 : i64, scratch_operands = 0 : i64, tpu.core_type = #tpu.core_type<tc>} {
    %c0 = arith.constant 0 : index
    %c0_0 = arith.constant 0 : index
    %0 = vector.load %arg0[%c0, %c0_0] : memref<32x64xf32, #tpu.memory_space<vmem>>, vector<32x64xf32>
    %1 = tpu.iota {dimensions = array<i32: 0>} : vector<32x32xi32>
    %2 = tpu.iota {dimensions = array<i32: 1>} : vector<32x32xi32>
    %c16_i32 = arith.constant 16 : i32
    %c0_i32 = arith.constant 0 : i32
    %3 = arith.cmpi eq, %c16_i32, %c0_i32 : i32
    %c1_i32 = arith.constant 1 : i32
    %4 = arith.select %3, %c1_i32, %c16_i32 : i32
    %5 = vector.broadcast %4 : i32 to vector<32x32xi32>
    %6 = arith.remsi %1, %5 : vector<32x32xi32>
    %c0_i32_1 = arith.constant 0 : i32
    %7 = vector.broadcast %c0_i32_1 : i32 to vector<32x32xi32>
    %8 = arith.cmpi ne, %6, %7 : vector<32x32xi32>
    %c0_i32_2 = arith.constant 0 : i32
    %9 = vector.broadcast %c0_i32_2 : i32 to vector<32x32xi32>
    %10 = arith.cmpi slt, %6, %9 : vector<32x32xi32>
    %c0_i32_3 = arith.constant 0 : i32
    %11 = arith.cmpi slt, %4, %c0_i32_3 : i32
    %12 = vector.broadcast %11 : i1 to vector<32x32xi1>
    %13 = vector.broadcast %12 : vector<32x32xi1> to vector<32x32xi1>
    %14 = arith.xori %10, %13 : vector<32x32xi1>
    %15 = arith.andi %14, %8 : vector<32x32xi1>
    %16 = vector.broadcast %4 : i32 to vector<32x32xi32>
    %17 = arith.addi %6, %16 : vector<32x32xi32>
    %18 = arith.select %15, %17, %6 : vector<32x32xi1>, vector<32x32xi32>
    %c1_i32_4 = arith.constant 1 : i32
    %19 = vector.broadcast %c1_i32_4 : i32 to vector<32x32xi32>
    %20 = arith.subi %1, %19 : vector<32x32xi32>
    %21 = arith.cmpi eq, %2, %20 : vector<32x32xi32>
    %c0_i32_5 = arith.constant 0 : i32
    %22 = vector.broadcast %c0_i32_5 : i32 to vector<32x32xi32>
    %23 = arith.cmpi ne, %18, %22 : vector<32x32xi32>
    %24 = arith.andi %21, %23 : vector<32x32xi1>
    %25 = arith.extui %24 : vector<32x32xi1> to vector<32x32xi32>
    %26 = arith.sitofp %25 : vector<32x32xi32> to vector<32x32xf32>
    %c1_i32_6 = arith.constant 1 : i32
    %27 = vector.broadcast %c1_i32_6 : i32 to vector<32x32xi32>
    %28 = arith.addi %1, %27 : vector<32x32xi32>
    %29 = arith.cmpi eq, %2, %28 : vector<32x32xi32>
    %c15_i32 = arith.constant 15 : i32
    %30 = vector.broadcast %c15_i32 : i32 to vector<32x32xi32>
    %31 = arith.cmpi ne, %18, %30 : vector<32x32xi32>
    %32 = arith.andi %29, %31 : vector<32x32xi1>
    %33 = arith.extui %32 : vector<32x32xi1> to vector<32x32xi32>
    %34 = arith.sitofp %33 : vector<32x32xi32> to vector<32x32xf32>
    %cst = arith.constant dense<0.000000e+00> : vector<32x64xf32>
    %35 = tpu.matmul %26, %0, %cst {dimension_numbers = #tpu.dot_dimension_numbers<[1], [0], [0], [1], [0, 0, 1, 1], [], []>} : vector<32x32xf32>, vector<32x64xf32>, vector<32x64xf32> -> vector<32x64xf32>
    %cst_7 = arith.constant dense<0.000000e+00> : vector<32x64xf32>
    %36 = tpu.matmul %34, %0, %cst_7 {dimension_numbers = #tpu.dot_dimension_numbers<[1], [0], [0], [1], [0, 0, 1, 1], [], []>} : vector<32x32xf32>, vector<32x64xf32>, vector<32x64xf32> -> vector<32x64xf32>
    %c0_8 = arith.constant 0 : index
    %c0_9 = arith.constant 0 : index
    %c0_10 = arith.constant 0 : index
    %37 = vector.load %arg1[%c0_8, %c0_9, %c0_10] : memref<3x64x64xf32, #tpu.memory_space<vmem>>, vector<1x64x64xf32>
    %38 = vector.shape_cast %37 : vector<1x64x64xf32> to vector<64x64xf32>
    %cst_11 = arith.constant dense<0.000000e+00> : vector<32x64xf32>
    %39 = tpu.matmul %35, %38, %cst_11 {dimension_numbers = #tpu.dot_dimension_numbers<[1], [0], [0], [1], [0, 0, 1, 1], [], []>} : vector<32x64xf32>, vector<64x64xf32>, vector<32x64xf32> -> vector<32x64xf32>
    %c1 = arith.constant 1 : index
    %c0_12 = arith.constant 0 : index
    %c0_13 = arith.constant 0 : index
    %40 = vector.load %arg1[%c1, %c0_12, %c0_13] : memref<3x64x64xf32, #tpu.memory_space<vmem>>, vector<1x64x64xf32>
    %41 = vector.shape_cast %40 : vector<1x64x64xf32> to vector<64x64xf32>
    %cst_14 = arith.constant dense<0.000000e+00> : vector<32x64xf32>
    %42 = tpu.matmul %0, %41, %cst_14 {dimension_numbers = #tpu.dot_dimension_numbers<[1], [0], [0], [1], [0, 0, 1, 1], [], []>} : vector<32x64xf32>, vector<64x64xf32>, vector<32x64xf32> -> vector<32x64xf32>
    %43 = arith.addf %39, %42 : vector<32x64xf32>
    %c2 = arith.constant 2 : index
    %c0_15 = arith.constant 0 : index
    %c0_16 = arith.constant 0 : index
    %44 = vector.load %arg1[%c2, %c0_15, %c0_16] : memref<3x64x64xf32, #tpu.memory_space<vmem>>, vector<1x64x64xf32>
    %45 = vector.shape_cast %44 : vector<1x64x64xf32> to vector<64x64xf32>
    %cst_17 = arith.constant dense<0.000000e+00> : vector<32x64xf32>
    %46 = tpu.matmul %36, %45, %cst_17 {dimension_numbers = #tpu.dot_dimension_numbers<[1], [0], [0], [1], [0, 0, 1, 1], [], []>} : vector<32x64xf32>, vector<64x64xf32>, vector<32x64xf32> -> vector<32x64xf32>
    %47 = arith.addf %43, %46 : vector<32x64xf32>
    %c0_18 = arith.constant 0 : index
    %c0_19 = arith.constant 0 : index
    %48 = vector.load %arg2[%c0_18, %c0_19] : memref<1x64xf32, #tpu.memory_space<vmem>>, vector<1x64xf32>
    %49 = vector.broadcast %48 : vector<1x64xf32> to vector<32x64xf32>
    %50 = arith.addf %47, %49 : vector<32x64xf32>
    %51 = tpu.iota {dimensions = array<i32: 0>} : vector<64x64xi32>
    %52 = tpu.iota {dimensions = array<i32: 1>} : vector<64x64xi32>
    %c4_i32 = arith.constant 4 : i32
    %c0_i32_20 = arith.constant 0 : i32
    %53 = arith.cmpi eq, %c4_i32, %c0_i32_20 : i32
    %c1_i32_21 = arith.constant 1 : i32
    %54 = arith.select %53, %c1_i32_21, %c4_i32 : i32
    %55 = vector.broadcast %54 : i32 to vector<64x64xi32>
    %56 = arith.remsi %51, %55 : vector<64x64xi32>
    %c0_i32_22 = arith.constant 0 : i32
    %57 = vector.broadcast %c0_i32_22 : i32 to vector<64x64xi32>
    %58 = arith.cmpi ne, %56, %57 : vector<64x64xi32>
    %c0_i32_23 = arith.constant 0 : i32
    %59 = vector.broadcast %c0_i32_23 : i32 to vector<64x64xi32>
    %60 = arith.cmpi slt, %56, %59 : vector<64x64xi32>
    %c0_i32_24 = arith.constant 0 : i32
    %61 = arith.cmpi slt, %54, %c0_i32_24 : i32
    %62 = vector.broadcast %61 : i1 to vector<64x64xi1>
    %63 = vector.broadcast %62 : vector<64x64xi1> to vector<64x64xi1>
    %64 = arith.xori %60, %63 : vector<64x64xi1>
    %65 = arith.andi %64, %58 : vector<64x64xi1>
    %66 = vector.broadcast %54 : i32 to vector<64x64xi32>
    %67 = arith.addi %56, %66 : vector<64x64xi32>
    %68 = arith.select %65, %67, %56 : vector<64x64xi1>, vector<64x64xi32>
    %c4_i32_25 = arith.constant 4 : i32
    %c0_i32_26 = arith.constant 0 : i32
    %69 = arith.cmpi eq, %c4_i32_25, %c0_i32_26 : i32
    %c1_i32_27 = arith.constant 1 : i32
    %70 = arith.select %69, %c1_i32_27, %c4_i32_25 : i32
    %71 = vector.broadcast %70 : i32 to vector<64x64xi32>
    %72 = arith.remsi %52, %71 : vector<64x64xi32>
    %c0_i32_28 = arith.constant 0 : i32
    %73 = vector.broadcast %c0_i32_28 : i32 to vector<64x64xi32>
    %74 = arith.cmpi ne, %72, %73 : vector<64x64xi32>
    %c0_i32_29 = arith.constant 0 : i32
    %75 = vector.broadcast %c0_i32_29 : i32 to vector<64x64xi32>
    %76 = arith.cmpi slt, %72, %75 : vector<64x64xi32>
    %c0_i32_30 = arith.constant 0 : i32
    %77 = arith.cmpi slt, %70, %c0_i32_30 : i32
    %78 = vector.broadcast %77 : i1 to vector<64x64xi1>
    %79 = vector.broadcast %78 : vector<64x64xi1> to vector<64x64xi1>
    %80 = arith.xori %76, %79 : vector<64x64xi1>
    %81 = arith.andi %80, %74 : vector<64x64xi1>
    %82 = vector.broadcast %70 : i32 to vector<64x64xi32>
    %83 = arith.addi %72, %82 : vector<64x64xi32>
    %84 = arith.select %81, %83, %72 : vector<64x64xi1>, vector<64x64xi32>
    %85 = arith.cmpi eq, %68, %84 : vector<64x64xi32>
    %86 = arith.extui %85 : vector<64x64xi1> to vector<64x64xi32>
    %87 = arith.sitofp %86 : vector<64x64xi32> to vector<64x64xf32>
    %cst_31 = arith.constant dense<0.000000e+00> : vector<64xf32>
    %88 = vector.multi_reduction <add>, %50, %cst_31 [0] : vector<32x64xf32> to vector<64xf32>
    %89 = vector.shape_cast %88 : vector<64xf32> to vector<1x64xf32>
    %cst_32 = arith.constant dense<0.000000e+00> : vector<1x64xf32>
    %90 = tpu.matmul %89, %87, %cst_32 {dimension_numbers = #tpu.dot_dimension_numbers<[1], [0], [0], [1], [0, 0, 1, 1], [], []>} : vector<1x64xf32>, vector<64x64xf32>, vector<1x64xf32> -> vector<1x64xf32>
    %cst_33 = arith.constant 5.120000e+02 : f32
    %91 = vector.broadcast %cst_33 : f32 to vector<1x64xf32>
    %92 = arith.divf %90, %91 : vector<1x64xf32>
    %93 = arith.mulf %50, %50 : vector<32x64xf32>
    %cst_34 = arith.constant dense<0.000000e+00> : vector<64xf32>
    %94 = vector.multi_reduction <add>, %93, %cst_34 [0] : vector<32x64xf32> to vector<64xf32>
    %95 = vector.shape_cast %94 : vector<64xf32> to vector<1x64xf32>
    %cst_35 = arith.constant dense<0.000000e+00> : vector<1x64xf32>
    %96 = tpu.matmul %95, %87, %cst_35 {dimension_numbers = #tpu.dot_dimension_numbers<[1], [0], [0], [1], [0, 0, 1, 1], [], []>} : vector<1x64xf32>, vector<64x64xf32>, vector<1x64xf32> -> vector<1x64xf32>
    %cst_36 = arith.constant 5.120000e+02 : f32
    %97 = vector.broadcast %cst_36 : f32 to vector<1x64xf32>
    %98 = arith.divf %96, %97 : vector<1x64xf32>
    %99 = arith.mulf %92, %92 : vector<1x64xf32>
    %100 = arith.subf %98, %99 : vector<1x64xf32>
    %101 = vector.broadcast %92 : vector<1x64xf32> to vector<32x64xf32>
    %102 = arith.subf %50, %101 : vector<32x64xf32>
    %cst_37 = arith.constant 9.99999974E-6 : f32
    %103 = vector.broadcast %cst_37 : f32 to vector<1x64xf32>
    %104 = arith.addf %100, %103 : vector<1x64xf32>
    %105 = math.rsqrt %104 : vector<1x64xf32>
    %106 = vector.broadcast %105 : vector<1x64xf32> to vector<32x64xf32>
    %107 = arith.mulf %102, %106 : vector<32x64xf32>
    %c0_38 = arith.constant 0 : index
    %c0_39 = arith.constant 0 : index
    %108 = vector.load %arg3[%c0_38, %c0_39] : memref<1x64xf32, #tpu.memory_space<vmem>>, vector<1x64xf32>
    %109 = vector.broadcast %108 : vector<1x64xf32> to vector<32x64xf32>
    %110 = arith.mulf %107, %109 : vector<32x64xf32>
    %c0_40 = arith.constant 0 : index
    %c0_41 = arith.constant 0 : index
    %111 = vector.load %arg4[%c0_40, %c0_41] : memref<1x64xf32, #tpu.memory_space<vmem>>, vector<1x64xf32>
    %112 = vector.broadcast %111 : vector<1x64xf32> to vector<32x64xf32>
    %113 = arith.addf %110, %112 : vector<32x64xf32>
    %cst_42 = arith.constant 0.000000e+00 : f32
    %114 = vector.broadcast %cst_42 : f32 to vector<32x64xf32>
    %115 = arith.maximumf %113, %114 : vector<32x64xf32>
    %c0_43 = arith.constant 0 : index
    %c0_44 = arith.constant 0 : index
    %116 = vector.load %arg5[%c0_43, %c0_44] : memref<32x64xf32, #tpu.memory_space<vmem>>, vector<32x64xf32>
    tpu.vector_store %arg5[%c0_43, %c0_44], %115 {strides = array<i32>} : memref<32x64xf32, #tpu.memory_space<vmem>>, vector<32x64xf32>,
    return
  }
}

</mosaic_0001>

<bundles_post_ra>
// kernel: tile.18
= control target key start
LH: loop header
LB: loop body
LE: loop exit
PB: predicated region body
PF: predicated region fallthrough
CT: control target
= control target key end

     0   :  { %s28_s0 = inlined_call_operand.vmem [shape: f32[4], index: 0, kind: input, shape index: {}]   ;;  %s29_s1 = inlined_call_operand.vmem [shape: f32[16,4], index: 1, kind: output, shape index: {}]  }
   0x1   :  { %v4_v0 = vld [vmem:[%s28_s0] ss:$0 sm:$0xff] }
   0x2   :  { %5 = vst [vmem:[%s29_s1] sm:$0xff] %v4_v0 }
   0x3   :  { %8 = vst [vmem:[%s29_s1 + $0x8] sm:$0xff] %v4_v0 }

// kernel: tile.19
= control target key start
LH: loop header
LB: loop body
LE: loop exit
PB: predicated region body
PF: predicated region fallthrough
CT: control target
= control target key end

     0   :  { %s131_s10 = smov 60   ;;  %s132_s11 = smov 52   ;;  %vm3_vm0 = vcmask 31744   ;;  %vm9_vm1 = vcmask 523744   ;;  %vm15_vm2 = vcmask 490944   ;;  %vm21_vm3 = vcmask 458144   ;;  %s207_s0 = inlined_call_operand.vmem [shape: f32[16,4], index: 0, kind: input, shape index: {}]   ;;  %s208_s1 = inlined_call_operand.vmem [shape: f32[1,64], index: 1, kind: output, shape index: {}]  }
   0x1   :  { %v101_v0 = vld [vmem:[%s207_s0 + $0xf] sm:$0x1]   ;;  %v103_v1 = vld [vmem:[%s207_s0 + $0xd] sm:$0x1]   ;;  %v105_v2 = vld [vmem:[%s207_s0 + $0xb] sm:$0x1]  }
   0x2   :  { %7 = vrot.lane.b32.xlu0 %v101_v0, %s131_s10  ;;  %19 = vrot.lane.b32.xlu1 %v103_v1, %s132_s11  ;;  %s133_s14 = smov 44   ;;  %v102_v3 = vld [vmem:[%s207_s0 + $0xe] sm:$0x1]   ;;  %v104_v4 = vld [vmem:[%s207_s0 + $0xc] sm:$0x1]   ;;  %s134_s19 = smov 56  }
   0x3   :  { %31 = vrot.lane.b32.xlu2 %v105_v2, %s133_s14  ;;  %s135_s20 = smov 48   ;;  %v106_v5 = vld [vmem:[%s207_s0 + $0xa] sm:$0x1]   ;;  %s136_s23 = smov 40   ;;  %v107_v6 = vld [vmem:[%s207_s0 + $0x9] sm:$0x1]  }
   0x4   :  { %v108_v7 = vld [vmem:[%s207_s0 + $0x8] sm:$0x1]   ;;  %s137_s28 = smov 36   ;;  %s138_s29 = smov 32   ;;  %v109_v8 = vld [vmem:[%s207_s0 + $0x7] sm:$0x1]  }
   0x5   :  { %s139_s3 = smov 28   ;;  %v110_v9 = vld [vmem:[%s207_s0 + $0x6] sm:$0x1]   ;;  %v111_v10 = vld [vmem:[%s207_s0 + $0x5] sm:$0x1]   ;;  %s140_s8 = smov 24  }
   0x6   :  { %s141_s9 = smov 20   ;;  %v112_v11 = vld [vmem:[%s207_s0 + $0x4] sm:$0x1]   ;;  %s142_s12 = smov 16   ;;  %v113_v12 = vld [vmem:[%s207_s0 + $0x3] sm:$0x1]  }
   0x7   :  { %v114_v13 = vld [vmem:[%s207_s0 + $0x2] sm:$0x1]   ;;  %s143_s17 = smov 12   ;;  %s144_s18 = smov 8   ;;  %v115_v14 = vld [vmem:[%s207_s0 + $0x1] sm:$0x1]  }
   0x8   :  { %s145_s21 = smov 4   ;;  %v2_v15 = vld [vmem:[%s207_s0] sm:$0x1]   ;;  %vm27_vm4 = vcmask 425344   ;;  %vm33_vm5 = vcmask 392544   ;;  %vm39_vm6 = vcmask 359744  }
   0x9   :  { %4 = vst.msk [vmem:[#allocation0] sm:$0x1] %vm3_vm0, %v2_v15   ;;  %vm45_vm7 = vcmask 326944   ;;  %vm51_vm8 = vcmask 294144   ;;  %vm57_vm9 = vcmask 261344   ;;  %vm63_vm10 = vcmask 228544  }
   0xa   :  { %13 = vrot.lane.b32.xlu0 %v102_v3, %s134_s19  ;;  %25 = vrot.lane.b32.xlu1 %v104_v4, %s135_s20  ;;  %vm69_vm11 = vcmask 195744   ;;  %vm75_vm12 = vcmask 162944   ;;  %vm81_vm13 = vcmask 130144   ;;  %vm87_vm14 = vcmask 97344  }
   0xb   :  { %37 = vrot.lane.b32.xlu2 %v106_v5, %s136_s23  ;;  %vm93_vm15 = vcmask 64544  }
  0x12   :  { %43 = vrot.lane.b32.xlu0 %v107_v6, %s137_s28  ;;  %49 = vrot.lane.b32.xlu1 %v108_v7, %s138_s29 }
  0x13   :  { %55 = vrot.lane.b32.xlu2 %v109_v8, %s139_s3 }
  0x1a   :  { %61 = vrot.lane.b32.xlu0 %v110_v9, %s140_s8  ;;  %67 = vrot.lane.b32.xlu1 %v111_v10, %s141_s9 }
  0x1b   :  { %73 = vrot.lane.b32.xlu2 %v112_v11, %s142_s12 }
  0x22   :  { %79 = vrot.lane.b32.xlu0 %v113_v12, %s143_s17  ;;  %85 = vrot.lane.b32.xlu1 %v114_v13, %s144_s18 }
  0x23   :  { %91 = vrot.lane.b32.xlu2 %v115_v14, %s145_s21 }
  0x5d   :  { %v32_v16 = vpop.permute.xlu2 %31  }
  0x65   :  { %v38_v17 = vpop.permute.xlu2 %37  }
  0x6d   :  { %v56_v18 = vpop.permute.xlu2 %55  }
  0x74   :  { %v8_v19 = vpop.permute.xlu0 %7   ;;  %v20_v20 = vpop.permute.xlu1 %19  }
  0x75   :  { %10 = vst.msk [vmem:[#allocation0] sm:$0x1] %vm9_vm1, %v8_v19   ;;  %v74_v21 = vpop.permute.xlu2 %73  }
  0x7c   :  { %v14_v22 = vpop.permute.xlu0 %13   ;;  %v26_v23 = vpop.permute.xlu1 %25  }
  0x7d   :  { %16 = vst.msk [vmem:[#allocation0] sm:$0x1] %vm15_vm2, %v14_v22   ;;  %v92_v24 = vpop.permute.xlu2 %91  }
  0x7e   :  { %22 = vst.msk [vmem:[#allocation0] sm:$0x1] %vm21_vm3, %v20_v20  }
  0x7f   :  { %28 = vst.msk [vmem:[#allocation0] sm:$0x1] %vm27_vm4, %v26_v23  }
  0x80   :  { %34 = vst.msk [vmem:[#allocation0] sm:$0x1] %vm33_vm5, %v32_v16  }
  0x81   :  { %40 = vst.msk [vmem:[#allocation0] sm:$0x1] %vm39_vm6, %v38_v17  }
  0x84   :  { %v44_v25 = vpop.permute.xlu0 %43   ;;  %v50_v26 = vpop.permute.xlu1 %49  }
  0x85   :  { %46 = vst.msk [vmem:[#allocation0] sm:$0x1] %vm45_vm7, %v44_v25  }
  0x86   :  { %52 = vst.msk [vmem:[#allocation0] sm:$0x1] %vm51_vm8, %v50_v26  }
  0x87   :  { %58 = vst.msk [vmem:[#allocation0] sm:$0x1] %vm57_vm9, %v56_v18  }
  0x8c   :  { %v62_v27 = vpop.permute.xlu0 %61   ;;  %v68_v28 = vpop.permute.xlu1 %67  }
  0x8d   :  { %64 = vst.msk [vmem:[#allocation0] sm:$0x1] %vm63_vm10, %v62_v27  }
  0x8e   :  { %70 = vst.msk [vmem:[#allocation0] sm:$0x1] %vm69_vm11, %v68_v28  }
  0x8f   :  { %76 = vst.msk [vmem:[#allocation0] sm:$0x1] %vm75_vm12, %v74_v21  }
  0x94   :  { %v80_v29 = vpop.permute.xlu0 %79   ;;  %v86_v30 = vpop.permute.xlu1 %85  }
  0x95   :  { %82 = vst.msk [vmem:[#allocation0] sm:$0x1] %vm81_vm13, %v80_v29  }
  0x96   :  { %88 = vst.msk [vmem:[#allocation0] sm:$0x1] %vm87_vm14, %v86_v30  }
  0x97   :  { %94 = vst.msk [vmem:[#allocation0] sm:$0x1] %vm93_vm15, %v92_v24  }
  0x9e   :  { %v97_v31 = vld [vmem:[#allocation0] sm:$0x1] }
  0x9f   :  { %100 = vst [vmem:[%s208_s1] sm:$0x1] %v97_v31 }

// kernel: residual_block_forward.1
= control target key start
LH: loop header
LB: loop body
LE: loop exit
PB: predicated region body
PF: predicated region fallthrough
CT: control target
= control target key end

     0   :  { %v24_v0 = vlaneseq  ;;  %vm127_vm0 = vcmask 261120   ;;  %v732_v17 = vmov 0.0   ;;  %s1002_s0 = inlined_call_operand.vmem [shape: f32[32,64], index: 0, kind: input, shape index: {}]   ;;  %s1003_s1 = inlined_call_operand.vmem [shape: f32[3,64,64], index: 1, kind: input, shape index: {}]   ;;  %s1004_s2 = inlined_call_operand.vmem [shape: f32[1,64], index: 2, kind: input, shape index: {}]   ;;  %s1005_s3 = inlined_call_operand.vmem [shape: f32[1,64], index: 3, kind: input, shape index: {}]   ;;  %s1006_s4 = inlined_call_operand.vmem [shape: f32[1,64], index: 4, kind: input, shape index: {}]   ;;  %s1007_s5 = inlined_call_operand.vmem [shape: f32[32,64], index: 5, kind: output, shape index: {}]  }
   0x1   :  { %v768_v1 = vld [vmem:[%s1002_s0 + $0x18] sm:$0xff]  ;;  %v773_v2 = vld [vmem:[%s1002_s0 + $0x10] sm:$0xff]  ;;  %v787_v6 = vld [vmem:[%s1002_s0 + $0x8] sm:$0xff] }
   0x2   :  { %152 = vmatpush.msra.mxu0 %v768_v1  ;;  %v776_v3 = vshrl.u32 %v24_v0, 7  ;;  %v778_v4 = vand.u32 127, %v24_v0  ;;  %193 = vmatpush.msra.mxu1 %v768_v1  ;;  %v671_v5 = vld [vmem:[%s1003_s1 + $0x78] sm:$0xff]  ;;  %v670_v7 = vld [vmem:[%s1003_s1 + $0x70] sm:$0xff]  ;;  %v669_v12 = vld [vmem:[%s1003_s1 + $0x68] sm:$0xff] }
   0x3   :  { %718 = vmatpush.msra.mxu3 %v768_v1  ;;  %248 = vmatpush.msra.mxu2 %v671_v5  ;;  %v807_v13 = vld [vmem:[%s1002_s0] sm:$0xff]  ;;  %v217_v25 = vld [vmem:[%s1003_s1 + $0x38] sm:$0xff]  ;;  %v216_v29 = vld [vmem:[%s1003_s1 + $0x30] sm:$0xff] }
   0x4   :  { %153 = vmatpush.msra.mxu0 %v773_v2  ;;  %v35_v8 = vand.u32 15, %v776_v3  ;;  %v644_v9 = vadd.s32 4294967295, %v776_v3  ;;  %194 = vmatpush.msra.mxu1 %v773_v2  ;;  %v798_v10 = vadd.s32 8, %v776_v3  ;;  %v103_v11 = vadd.s32 1, %v776_v3  ;;  %v668_v22 = vld [vmem:[%s1003_s1 + $0x60] sm:$0xff]  ;;  %v687_v26 = vld [vmem:[%s1003_s1 + $0xb8] sm:$0xff] }
   0x5   :  { %719 = vmatpush.msra.mxu3 %v773_v2  ;;  %v811_v14 = vadd.s32 16, %v776_v3  ;;  %v814_v15 = vadd.s32 24, %v776_v3  ;;  %249 = vmatpush.msra.mxu2 %v670_v7  ;;  %v667_v27 = vld [vmem:[%s1003_s1 + $0x58] sm:$0xff]  ;;  %v686_v30 = vld [vmem:[%s1003_s1 + $0xb0] sm:$0xff]  ;;  %v215_v33 = vld [vmem:[%s1003_s1 + $0x28] sm:$0xff]  ;;  %v375_v63 = vadd.s32 56, %v776_v3 }
   0x6   :  { %154 = vmatpush.msra.mxu0 %v787_v6  ;;  %vm83_vm1 = vcmp.eq.s32.totalorder %v778_v4, %v644_v9  ;;  %vm87_vm2 = vcmp.ne.s32.totalorder %v35_v8, 0  ;;  %195 = vmatpush.msra.mxu1 %v787_v6  ;;  %v645_v16 = vadd.s32 4294967295, %v798_v10  ;;  %vm107_vm3 = vcmp.eq.s32.totalorder %v778_v4, %v103_v11  ;;  %v666_v32 = vld [vmem:[%s1003_s1 + $0x50] sm:$0xff]  ;;  %v685_v34 = vld [vmem:[%s1003_s1 + $0xa8] sm:$0xff]  ;;  %v214_v39 = vld [vmem:[%s1003_s1 + $0x20] sm:$0xff] }
   0x7   :  { %vm91_vm4 = vmand %vm83_vm1, %vm87_vm2  ;;  %720 = vmatpush.msra.mxu3 %v787_v6  ;;  %v652_v18 = vsel %vm107_vm3, 1.0, %v732_v17  ;;  %v49_v19 = vand.u32 15, %v811_v14  ;;  %v646_v20 = vadd.s32 4294967295, %v811_v14  ;;  %v42_v21 = vand.u32 15, %v798_v10  ;;  %250 = vmatpush.msra.mxu2 %v669_v12  ;;  %v665_v35 = vld [vmem:[%s1003_s1 + $0x48] sm:$0xff]  ;;  %v684_v40 = vld [vmem:[%s1003_s1 + $0xa0] sm:$0xff] }
   0x8   :  { %155 = vmatpush.msra.mxu0 %v807_v13  ;;  %v648_v23 = vsel %vm91_vm4, 1.0, %v732_v17  ;;  %196 = vmatpush.msra.mxu1 %v807_v13  ;;  %v104_v24 = vadd.s32 1, %v798_v10  ;;  %v647_v28 = vadd.s32 4294967295, %v814_v15  ;;  %vm84_vm10 = vcmp.eq.s32.totalorder %v778_v4, %v645_v16  ;;  %v213_v42 = vld [vmem:[%s1003_s1 + $0x18] sm:$0xff]  ;;  %v212_v45 = vld [vmem:[%s1003_s1 + $0x10] sm:$0xff]  ;;  %v211_v47 = vld [vmem:[%s1003_s1 + $0x8] sm:$0xff] }
   0x9   :  { %656 = vmatmul.msk.f32.vlgmr.msra.gmra.mxu0 %vm127_vm0, %v648_v23  ;;  %660 = vmatmul.msk.f32.vlgmr.msra.gmra.mxu1 %vm127_vm0, %v652_v18  ;;  %vm85_vm5 = vcmp.eq.s32.totalorder %v778_v4, %v646_v20  ;;  %vm89_vm6 = vcmp.ne.s32.totalorder %v49_v19, 0  ;;  %vm112_vm7 = vcmp.ne.s32.totalorder %v42_v21, 15  ;;  %v649_v36 = vsel %vm84_vm10, 1.0, %v732_v17  ;;  %v210_v48 = vld [vmem:[%s1003_s1] sm:$0xff]  ;;  %v683_v51 = vld [vmem:[%s1003_s1 + $0x98] sm:$0xff]  ;;  %v682_v52 = vld [vmem:[%s1003_s1 + $0x90] sm:$0xff] }
   0xa   :  { %721 = vmatpush.msra.mxu3 %v807_v13  ;;  %vm93_vm8 = vmand %vm85_vm5, %vm89_vm6  ;;  %vm108_vm9 = vcmp.eq.s32.totalorder %v778_v4, %v104_v24  ;;  %251 = vmatpush.msra.mxu2 %v668_v22  ;;  %vm86_vm12 = vcmp.eq.s32.totalorder %v778_v4, %v647_v28  ;;  %v105_v38 = vadd.s32 1, %v811_v14  ;;  %v56_v43 = vand.u32 15, %v814_v15  ;;  %v664_v50 = vld [vmem:[%s1003_s1 + $0x40] sm:$0xff]  ;;  %v681_v53 = vld [vmem:[%s1003_s1 + $0x88] sm:$0xff] }
   0xb   :  { %v650_v31 = vsel %vm93_vm8, 1.0, %v732_v17  ;;  %vm116_vm11 = vmand %vm108_vm9, %vm112_vm7  ;;  %339 = vmatpush.msrb.mxu0 %v687_v26  ;;  %v651_v41 = vsel %vm86_vm12, 1.0, %v732_v17  ;;  %v106_v44 = vadd.s32 1, %v814_v15  ;;  %vm227_vm2 = vcmask 523264   ;;  %v680_v54 = vld [vmem:[%s1003_s1 + $0x80] sm:$0xff] }
   0xc   :  { %289 = vmatpush.msrb.mxu3 %v217_v25  ;;  %252 = vmatpush.msra.mxu2 %v667_v27  ;;  %v653_v37 = vsel %vm116_vm11, 1.0, %v732_v17  ;;  %vm109_vm13 = vcmp.eq.s32.totalorder %v778_v4, %v105_v38  ;;  %vm114_vm15 = vcmp.ne.s32.totalorder %v56_v43, 15  ;;  %v476_v0 = vand.u32 3, %v778_v4 }
   0xd   :  { %658 = vmatmul.msk.f32.vlgmr.msra.gmra.mxu3 %vm127_vm0, %v650_v31  ;;  %340 = vmatpush.msrb.mxu0 %v686_v30  ;;  %v654_v46 = vsel %vm109_vm13, 1.0, %v732_v17  ;;  %vm110_vm14 = vcmp.eq.s32.totalorder %v778_v4, %v106_v44  ;;  %v374_v7 = vadd.s32 48, %v776_v3  ;;  %v373_v8 = vadd.s32 40, %v776_v3 }
   0xe   :  { %290 = vmatpush.msrb.mxu3 %v216_v29  ;;  %253 = vmatpush.msra.mxu2 %v666_v32  ;;  %vm118_vm1 = vmand %vm110_vm14, %vm114_vm15  ;;  %v372_v4 = vadd.s32 32, %v776_v3  ;;  %v401_v18 = vand.u32 3, %v814_v15  ;;  %v394_v19 = vand.u32 3, %v811_v14  ;;  %v387_v20 = vand.u32 3, %v798_v10 }
   0xf   :  { %341 = vmatpush.msrb.mxu0 %v685_v34  ;;  %v655_v49 = vsel %vm118_vm1, 1.0, %v732_v17  ;;  %v422_v9 = vand.u32 3, %v374_v7  ;;  %v415_v11 = vand.u32 3, %v373_v8  ;;  %v380_v21 = vand.u32 3, %v776_v3  ;;  %v725_v3 = vld [vmem:[%s1004_s2] ss:$0 sm:$0xff] }
  0x10   :  { %291 = vmatpush.msrb.mxu3 %v215_v33  ;;  %254 = vmatpush.msra.mxu2 %v665_v35  ;;  %v408_v16 = vand.u32 3, %v372_v4  ;;  %vm487_vm6 = vcmp.eq.s32.totalorder %v401_v18, %v476_v0  ;;  %vm486_vm7 = vcmp.eq.s32.totalorder %v394_v19, %v476_v0  ;;  %vm485_vm8 = vcmp.eq.s32.totalorder %v387_v20, %v476_v0 }
  0x11   :  { %657 = vmatmul.msk.f32.gmra.mxu0 %vm127_vm0, %v649_v36  ;;  %661 = vmatmul.msk.f32.gmra.mxu1 %vm127_vm0, %v653_v37  ;;  %vm490_vm3 = vcmp.eq.s32.totalorder %v422_v9, %v476_v0  ;;  %vm489_vm4 = vcmp.eq.s32.totalorder %v415_v11, %v476_v0  ;;  %vm484_vm9 = vcmp.eq.s32.totalorder %v380_v21, %v476_v0 }
  0x12   :  { %292 = vmatpush.msrb.mxu3 %v214_v39  ;;  %342 = vmatpush.msrb.mxu0 %v684_v40  ;;  %vm488_vm5 = vcmp.eq.s32.totalorder %v408_v16, %v476_v0 }
  0x13   :  { %255 = vmatpush.msra.mxu2 %v664_v50 }
  0x14   :  { %293 = vmatpush.msrb.mxu3 %v213_v42  ;;  %672 = vmatmul.msk.f32.vlgmr.msra.gmra.mxu2 %vm227_vm2, %v807_v13 }
  0x15   :  { %659 = vmatmul.msk.f32.gmra.mxu3 %vm127_vm0, %v651_v41  ;;  %343 = vmatpush.msrb.mxu0 %v683_v51 }
  0x16   :  { %294 = vmatpush.msrb.mxu3 %v212_v45 }
  0x17   :  { %344 = vmatpush.msrb.mxu0 %v682_v52 }
  0x18   :  { %295 = vmatpush.msrb.mxu3 %v211_v47 }
  0x19   :  { %662 = vmatmul.msk.f32.gmra.mxu1 %vm127_vm0, %v654_v46  ;;  %345 = vmatpush.msrb.mxu0 %v681_v53 }
  0x1a   :  { %296 = vmatpush.msrb.mxu3 %v210_v48 }
  0x1b   :  { %346 = vmatpush.msrb.mxu0 %v680_v54 }
  0x1c   :  { %673 = vmatmul.msk.f32.gmra.mxu2 %vm227_vm2, %v787_v6 }
  0x21   :  { %663 = vmatmul.msk.f32.gmra.mxu1 %vm127_vm0, %v655_v49 }
  0x24   :  { %674 = vmatmul.msk.f32.gmra.mxu2 %vm227_vm2, %v773_v2  ;;  %v733_v2 = vmov 1.0  }
  0x2c   :  { %675 = vmatmul.msk.f32.gmra.mxu2 %vm227_vm2, %v768_v1  ;;  %v429_v1 = vand.u32 3, %v375_v63 }
  0x2e   :  { %vm491_vm0 = vcmp.eq.s32.totalorder %v429_v1, %v476_v0 }
  0x2f   :  { %709 = vmatpush.msk.msrb.mxu2 %vm491_vm0, %v733_v2  ;;  %700 = vmatpush.msk.msrb.mxu1 %vm491_vm0, %v733_v2 }
  0x31   :  { %710 = vmatpush.msk.msrb.mxu2 %vm490_vm3, %v733_v2  ;;  %701 = vmatpush.msk.msrb.mxu1 %vm490_vm3, %v733_v2 }
  0x33   :  { %711 = vmatpush.msk.msrb.mxu2 %vm489_vm4, %v733_v2  ;;  %702 = vmatpush.msk.msrb.mxu1 %vm489_vm4, %v733_v2 }
  0x35   :  { %712 = vmatpush.msk.msrb.mxu2 %vm488_vm5, %v733_v2  ;;  %703 = vmatpush.msk.msrb.mxu1 %vm488_vm5, %v733_v2 }
  0x37   :  { %713 = vmatpush.msk.msrb.mxu2 %vm487_vm6, %v733_v2  ;;  %704 = vmatpush.msk.msrb.mxu1 %vm487_vm6, %v733_v2 }
  0x39   :  { %714 = vmatpush.msk.msrb.mxu2 %vm486_vm7, %v733_v2  ;;  %705 = vmatpush.msk.msrb.mxu1 %vm486_vm7, %v733_v2 }
  0x3b   :  { %715 = vmatpush.msk.msrb.mxu2 %vm485_vm8, %v733_v2  ;;  %706 = vmatpush.msk.msrb.mxu1 %vm485_vm8, %v733_v2 }
  0x3d   :  { %716 = vmatpush.msk.msrb.mxu2 %vm484_vm9, %v733_v2  ;;  %707 = vmatpush.msk.msrb.mxu1 %vm484_vm9, %v733_v2 }
  0x86   :  { %v157_v55 = vpop.f32.mrf.mxu0  ;;  %v198_v56 = vpop.f32.mrf.mxu1 }
  0x87   :  { %676 = vmatmul.msk.f32.vlgmr.msrb.gmra.mxu3 %vm227_vm2, %v157_v55  ;;  %688 = vmatmul.msk.f32.vlgmr.msrb.gmra.mxu0 %vm227_vm2, %v198_v56 }
  0x8e   :  { %v160_v57 = vpop.f32.mrf.mxu0  ;;  %v201_v58 = vpop.f32.mrf.mxu1 }
  0x8f   :  { %677 = vmatmul.msk.f32.gmra.mxu3 %vm227_vm2, %v160_v57  ;;  %689 = vmatmul.msk.f32.gmra.mxu0 %vm227_vm2, %v201_v58 }
  0x90   :  { %v163_v59 = vpop.f32.mrf.mxu3 }
  0x96   :  { %v204_v60 = vpop.f32.mrf.mxu1 }
  0x97   :  { %678 = vmatmul.msk.f32.gmra.mxu3 %vm227_vm2, %v163_v59  ;;  %690 = vmatmul.msk.f32.gmra.mxu0 %vm227_vm2, %v204_v60  ;;  %v257_v5 = vpop.f32.mrf.mxu2 }
  0x98   :  { %v166_v61 = vpop.f32.mrf.mxu3 }
  0x9e   :  { %v207_v62 = vpop.f32.mrf.mxu1 }
  0x9f   :  { %679 = vmatmul.msk.f32.gmra.mxu3 %vm227_vm2, %v166_v61  ;;  %691 = vmatmul.msk.f32.gmra.mxu0 %vm227_vm2, %v207_v62  ;;  %v260_v13 = vpop.f32.mrf.mxu2 }
  0xa7   :  { %v263_v15 = vpop.f32.mrf.mxu2 }
  0xaf   :  { %v266_v32 = vpop.f32.mrf.mxu2 }
 0x104   :  { %v348_v6 = vpop.f32.mrf.mxu0 }
 0x10a   :  { %v298_v12 = vpop.f32.mrf.mxu3 }
 0x10b   :  { %v299_v14 = vadd.f32 %v298_v12, %v257_v5 }
 0x10c   :  { %v351_v17 = vpop.f32.mrf.mxu0 }
 0x10d   :  { %v360_v26 = vadd.f32 %v348_v6, %v299_v14  ;;  %v734_v6 = vmov 512.0  }
 0x10e   :  { %728 = vrcp.f32 %v734_v6 }
 0x10f   :  { %v948_v30 = vadd.f32 %v725_v3, %v360_v26 }
 0x111   :  { %v552_v36 = vmul.f32 %v948_v30, %v948_v30  ;;  %v508_v40 = vsel %vm227_vm2, %v948_v30, 0.0 }
 0x112   :  { %v301_v22 = vpop.f32.mrf.mxu3 }
 0x113   :  { %v302_v23 = vadd.f32 %v301_v22, %v260_v13  ;;  %v556_v45 = vsel %vm227_vm2, %v552_v36, 0.0 }
 0x114   :  { %v354_v10 = vpop.f32.mrf.mxu0  ;;  %v729_v7 = vpop.eup %728 }
 0x115   :  { %v361_v24 = vadd.f32 %v351_v17, %v302_v23  ;;  %v545_v8 = vmul.f32 512.0, %v729_v7  ;;  %vm549_vm10 = vweird.f32 %v729_v7 }
 0x117   :  { %v946_v28 = vadd.f32 %v725_v3, %v361_v24  ;;  %v546_v9 = vsub.f32 1.0, %v545_v8 }
 0x119   :  { %v553_v33 = vmul.f32 %v946_v28, %v946_v28  ;;  %v509_v37 = vsel %vm227_vm2, %v946_v28, 0.0  ;;  %v547_v11 = vmul.f32 %v729_v7, %v546_v9 }
 0x11a   :  { %v304_v25 = vpop.f32.mrf.mxu3  ;;  %v510_v44 = vadd.f32 %v509_v37, %v508_v40 }
 0x11b   :  { %v305_v27 = vadd.f32 %v304_v25, %v263_v15  ;;  %v557_v41 = vsel %vm227_vm2, %v553_v33, 0.0  ;;  %v548_v12 = vadd.f32 %v729_v7, %v547_v11 }
 0x11c   :  { %v357_v35 = vpop.f32.mrf.mxu0  ;;  %v558_v48 = vadd.f32 %v557_v41, %v556_v45 }
 0x11d   :  { %v362_v29 = vadd.f32 %v354_v10, %v305_v27  ;;  %v550_v13 = vsel %vm549_vm10, %v729_v7, %v548_v12 }
 0x11f   :  { %v950_v31 = vadd.f32 %v725_v3, %v362_v29 }
 0x121   :  { %v554_v38 = vmul.f32 %v950_v31, %v950_v31  ;;  %v511_v42 = vsel %vm227_vm2, %v950_v31, 0.0 }
 0x122   :  { %v307_v34 = vpop.f32.mrf.mxu3  ;;  %v512_v49 = vadd.f32 %v511_v42, %v510_v44 }
 0x123   :  { %v308_v39 = vadd.f32 %v307_v34, %v266_v32  ;;  %v559_v46 = vsel %vm227_vm2, %v554_v38, 0.0  ;;  %v726_v34 = vld [vmem:[%s1005_s3] ss:$0 sm:$0xff] }
 0x124   :  { %v560_v52 = vadd.f32 %v559_v46, %v558_v48 }
 0x125   :  { %v363_v43 = vadd.f32 %v357_v35, %v308_v39 }
 0x127   :  { %v967_v47 = vadd.f32 %v725_v3, %v363_v43 }
 0x129   :  { %v513_v50 = vsel %vm227_vm2, %v967_v47, 0.0  ;;  %v555_v51 = vmul.f32 %v967_v47, %v967_v47 }
 0x12a   :  { %v514_v53 = vadd.f32 %v513_v50, %v512_v49 }
 0x12b   :  { %v561_v54 = vsel %vm227_vm2, %v555_v51, 0.0 }
 0x12c   :  { %v515_v55 = vrot.slane %v514_v53, 4  ;;  %v562_v56 = vadd.f32 %v561_v54, %v560_v52 }
 0x12e   :  { %v516_v57 = vadd.f32 %v515_v55, %v514_v53  ;;  %v563_v58 = vrot.slane %v562_v56, 4 }
 0x130   :  { %v517_v59 = vrot.slane %v516_v57, 2  ;;  %v564_v60 = vadd.f32 %v563_v58, %v562_v56 }
 0x132   :  { %v518_v61 = vadd.f32 %v517_v59, %v516_v57  ;;  %v565_v62 = vrot.slane %v564_v60, 2 }
 0x134   :  { %v519_v63 = vrot.slane %v518_v61, 1  ;;  %v566_v0 = vadd.f32 %v565_v62, %v564_v60 }
 0x136   :  { %v520_v1 = vadd.f32 %v519_v63, %v518_v61  ;;  %v567_v2 = vrot.slane %v566_v0, 1 }
 0x138   :  { %708 = vmatmul.msk.f32.vlgmr.msrb.gmra.mxu1 %vm227_vm2, %v520_v1  ;;  %v568_v5 = vadd.f32 %v567_v2, %v566_v0 }
 0x13a   :  { %717 = vmatmul.msk.f32.vlgmr.msrb.gmra.mxu2 %vm227_vm2, %v568_v5 }
 0x1b5   :  { %v541_v4 = vpop.f32.mrf.mxu1 }
 0x1b6   :  { %v551_v16 = vmul.f32 %v550_v13, %v541_v4 }
 0x1b8   :  { %v593_v18 = vmul.f32 %v551_v16, %v551_v16  ;;  %v595_v10 = vperm.slane %v551_v16, 0 }
 0x1ba   :  { %v596_v26 = vsub.f32 %v948_v30, %v595_v10  ;;  %v597_v27 = vsub.f32 %v946_v28, %v595_v10  ;;  %v598_v29 = vsub.f32 %v950_v31, %v595_v10  ;;  %v599_v32 = vsub.f32 %v967_v47, %v595_v10  ;;  %v727_v30 = vld [vmem:[%s1006_s4] ss:$0 sm:$0xff] }
 0x1bd   :  { %v589_v17 = vpop.f32.mrf.mxu2 }
 0x1be   :  { %v592_v19 = vmul.f32 %v589_v17, %v550_v13 }
 0x1c0   :  { %v594_v20 = vsub.f32 %v592_v19, %v593_v18 }
 0x1c2   :  { %v600_v21 = vadd.f32 1e-05, %v594_v20 }
 0x1c4   :  { %730 = vrsqrt.f32 %v600_v21  ;;  %vm607_vm12 = vweird.f32 %v600_v21 }
 0x1ca   :  { %v731_v22 = vpop.eup %730 }
 0x1cb   :  { %v602_v23 = vmul.f32 %v731_v22, %v600_v21  ;;  %vm608_vm11 = vweird.f32 %v731_v22 }
 0x1cc   :  { %vm609_vm13 = vmor %vm607_vm12, %vm608_vm11 }
 0x1cd   :  { %v603_v15 = vmul.f32 %v731_v22, %v602_v23 }
 0x1cf   :  { %v604_v14 = vmul.f32 0.5, %v603_v15 }
 0x1d1   :  { %v605_v24 = vsub.f32 1.5, %v604_v14 }
 0x1d3   :  { %v606_v25 = vmul.f32 %v731_v22, %v605_v24 }
 0x1d5   :  { %v610_v3 = vsel %vm609_vm13, %v731_v22, %v606_v25 }
 0x1d6   :  { %v611_v33 = vperm.slane %v610_v3, 0 }
 0x1d8   :  { %v612_v35 = vmul.f32 %v611_v33, %v596_v26  ;;  %v613_v36 = vmul.f32 %v611_v33, %v597_v27  ;;  %v614_v37 = vmul.f32 %v611_v33, %v598_v29  ;;  %v615_v38 = vmul.f32 %v611_v33, %v599_v32 }
 0x1da   :  { %v620_v39 = vmul.f32 %v726_v34, %v612_v35  ;;  %v621_v40 = vmul.f32 %v726_v34, %v613_v36  ;;  %v622_v28 = vmul.f32 %v726_v34, %v614_v37  ;;  %v623_v41 = vmul.f32 %v726_v34, %v615_v38 }
 0x1dc   :  { %v628_v31 = vadd.f32 %v727_v30, %v620_v39  ;;  %v629_v42 = vadd.f32 %v727_v30, %v621_v40  ;;  %v630_v43 = vadd.f32 %v727_v30, %v622_v28  ;;  %v631_v44 = vadd.f32 %v727_v30, %v623_v41 }
 0x1de   :  { %v632_v45 = vmax.f32 %v628_v31, 0.0  ;;  %v633_v46 = vmax.f32 %v629_v42, 0.0  ;;  %v634_v47 = vmax.f32 %v630_v43, 0.0  ;;  %v635_v48 = vmax.f32 %v631_v44, 0.0 }
 0x1e0   :  { %636 = vst.msk [vmem:[%s1007_s5] sm:$0xff] %vm227_vm2, %v632_v45 }
 0x1e1   :  { %637 = vst.msk [vmem:[%s1007_s5 + $0x8] sm:$0xff] %vm227_vm2, %v633_v46 }
 0x1e2   :  { %638 = vst.msk [vmem:[%s1007_s5 + $0x10] sm:$0xff] %vm227_vm2, %v634_v47 }
 0x1e3   :  { %639 = vst.msk [vmem:[%s1007_s5 + $0x18] sm:$0xff] %vm227_vm2, %v635_v48 }

</bundles_post_ra>
